<compile_context>
chip_gen: v7x
topology: tpu7x:2x2x1
jax: 0.10.0
libtpu: 0.0.40
codegen_flags: <defaults>
</compile_context>

<pallas_src>
import jax
import jax.numpy as jnp
from jax import lax
from jax.experimental import pallas as pl
from jax.experimental.pallas import tpu as pltpu


def _round_up(x: int, m: int) -> int:
    return ((x + m - 1) // m) * m


def _cdiv(a: int, b: int) -> int:
    return -(-a // b)


def _pick_tile(dim_aligned: int, cap: int, align: int):
    """Pick (tile, padded_dim) with tile % align == 0 and padded_dim % tile == 0,
    minimizing padding waste while keeping tile ~<= cap."""
    cap = max(cap, align)
    if dim_aligned <= cap:
        return dim_aligned, dim_aligned
    nblocks = _cdiv(dim_aligned, cap)
    tile = _round_up(_cdiv(dim_aligned, nblocks), align)
    return tile, tile * nblocks


def linear_relu_kernel_inplace(x_ref, w_ref, o_ref):
    """f32 output: accumulate the MXU result directly in the resident output tile.

    x_ref: (tm, tk) tile of x        [batch, in_features]
    w_ref: (tn, tk) tile of weight   [out_features, in_features] (PyTorch layout)
    o_ref: (tm, tn) f32 output tile  (k-invariant block index -> VMEM resident)
    """
    k = pl.program_id(2)

    @pl.when(k == 0)
    def _():
        o_ref[...] = jnp.zeros_like(o_ref)

    o_ref[...] += lax.dot_general(
        x_ref[...],
        w_ref[...],
        dimension_numbers=(((1,), (1,)), ((), ())),   # x @ W^T
        preferred_element_type=jnp.float32,
    )

    @pl.when(k == pl.num_programs(2) - 1)
    def _():
        o_ref[...] = jnp.maximum(o_ref[...], 0.0)


def linear_relu_kernel_acc(x_ref, w_ref, o_ref, acc_ref):
    """Sub-f32 output: accumulate in an f32 VMEM scratch, cast on the last k step."""
    k = pl.program_id(2)

    @pl.when(k == 0)
    def _():
        acc_ref[...] = jnp.zeros_like(acc_ref)

    acc_ref[...] += lax.dot_general(
        x_ref[...],
        w_ref[...],
        dimension_numbers=(((1,), (1,)), ((), ())),
        preferred_element_type=jnp.float32,
    )

    @pl.when(k == pl.num_programs(2) - 1)
    def _():
        o_ref[...] = jnp.maximum(acc_ref[...], 0.0).astype(o_ref.dtype)


def base_module_forward(x, weight, *, tm_cap=512, tn_cap=1024, tk_cap=1024):
    """x: [B, in_features]; weight: [out_features, in_features] (PyTorch layout).

    Returns ReLU(x @ weight.T) with shape [B, out_features].
    """
    B, K = x.shape
    N, K2 = weight.shape
    assert K == K2, "in_features mismatch between x and weight"

    out_dtype = x.dtype
    m_align = 16 if out_dtype == jnp.bfloat16 else 8

    # Pad each axis only to its alignment, then derive tiles with minimal waste.
    Bm = _round_up(B, m_align)
    Nn = _round_up(N, 128)
    Kk = _round_up(K, 128)

    tm, Bp = _pick_tile(Bm, tm_cap, m_align)
    tn, Np = _pick_tile(Nn, tn_cap, 128)
    tk, Kp = _pick_tile(Kk, tk_cap, 128)

    # v7x megacore: guarantee >= 2 parallel output blocks when N allows it,
    # so both TensorCores (and their DMA engines) get work.
    if (Bp // tm) * (Np // tn) == 1 and Np >= 256:
        tn = _round_up(_cdiv(Np, 2), 128)
        Np = 2 * tn

    # Zero-padding is exact for matmul + ReLU; padded rows/cols sliced off below.
    xp = x if (Bp == B and Kp == K) else jnp.pad(x, ((0, Bp - B), (0, Kp - K)))
    wp = weight if (Np == N and Kp == K) else jnp.pad(weight, ((0, Np - N), (0, Kp - K)))

    grid = (Bp // tm, Np // tn, Kp // tk)

    itemsize = jnp.dtype(out_dtype).itemsize
    cost = pl.CostEstimate(
        flops=2 * Bp * Np * Kp,
        bytes_accessed=itemsize * (Bp * Kp + Np * Kp + Bp * Np),
        transcendentals=0,
    )

    common = dict(
        out_shape=jax.ShapeDtypeStruct((Bp, Np), out_dtype),
        grid=grid,
        in_specs=[
            pl.BlockSpec((tm, tk), lambda i, j, k: (i, k)),  # x tile
            pl.BlockSpec((tn, tk), lambda i, j, k: (j, k)),  # weight tile ([N, K])
        ],
        out_specs=pl.BlockSpec((tm, tn), lambda i, j, k: (i, j)),
        compiler_params=pltpu.CompilerParams(
            dimension_semantics=("parallel", "parallel", "arbitrary"),
            vmem_limit_bytes=48 * 1024 * 1024,
        ),
        cost_estimate=cost,
    )

    if out_dtype == jnp.float32:
        out = pl.pallas_call(linear_relu_kernel_inplace, **common)(xp, wp)
    else:
        out = pl.pallas_call(
            linear_relu_kernel_acc,
            scratch_shapes=[pltpu.VMEM((tm, tn), jnp.float32)],
            **common,
        )(xp, wp)

    if Bp != B or Np != N:
        out = out[:B, :N]
    return out


if __name__ == "__main__":
    batch, in_features, out_features = 8, 32, 16

    key = jax.random.PRNGKey(0)
    kx, kw = jax.random.split(key)
    x = jax.random.normal(kx, (batch, in_features), dtype=jnp.float32)
    # Deterministic "Kaiming-uniform-like" init for nn.Linear weight [out, in]
    bound = 1.0 / jnp.sqrt(in_features)
    weight = jax.random.uniform(
        kw, (out_features, in_features), dtype=jnp.float32, minval=-bound, maxval=bound
    )

    out = base_module_forward(x, weight)
    jax.block_until_ready(out)

    # Reference check (plain JAX) to confirm semantics.
    ref = jnp.maximum(x @ weight.T, 0.0)
    assert out.shape == (batch, out_features)
    assert jnp.allclose(out, ref, atol=1e-5, rtol=1e-5)

    print("KERNEL_OK")
</pallas_src>

<mosaic_0001>
module attributes {stable_mosaic.version = 11 : i64} {
  func.func @linear_relu_kernel_inplace(%arg0: i32, %arg1: i32, %arg2: i32, %arg3: memref<8x128xf32, #tpu.memory_space<vmem>>, %arg4: memref<128x128xf32, #tpu.memory_space<vmem>>, %arg5: memref<8x128xf32, #tpu.memory_space<vmem>>) attributes {dimension_semantics = [#tpu.dimension_semantics<parallel>, #tpu.dimension_semantics<parallel>, #tpu.dimension_semantics<arbitrary>], iteration_bounds = array<i64: 1, 1, 1>, scalar_prefetch = 0 : i64, scratch_operands = 0 : i64, tpu.core_type = #tpu.core_type<tc>, window_params = [{transform_indices = @transform_0, window_bounds = array<i64: 8, 128>}, {transform_indices = @transform_1, window_bounds = array<i64: 128, 128>}, {transform_indices = @transform_2, window_bounds = array<i64: 8, 128>}]} {
    %c0_i32 = arith.constant 0 : i32
    %0 = arith.cmpi eq, %arg2, %c0_i32 : i32
    %1 = arith.extui %0 : i1 to i32
    %c0_i32_0 = arith.constant 0 : i32
    %2 = arith.cmpi ne, %1, %c0_i32_0 : i32
    scf.if %2 {
      %cst_10 = arith.constant 0.000000e+00 : f32
      %12 = vector.broadcast %cst_10 : f32 to vector<8x128xf32>
      %c0_11 = arith.constant 0 : index
      %c0_12 = arith.constant 0 : index
      %13 = vector.load %arg5[%c0_11, %c0_12] : memref<8x128xf32, #tpu.memory_space<vmem>>, vector<8x128xf32>
      tpu.vector_store %arg5[%c0_11, %c0_12], %12 {strides = array<i32>} : memref<8x128xf32, #tpu.memory_space<vmem>>, vector<8x128xf32>,
    } else {
    }
    %c0 = arith.constant 0 : index
    %c0_1 = arith.constant 0 : index
    %3 = vector.load %arg5[%c0, %c0_1] : memref<8x128xf32, #tpu.memory_space<vmem>>, vector<8x128xf32>
    %c0_2 = arith.constant 0 : index
    %c0_3 = arith.constant 0 : index
    %4 = vector.load %arg3[%c0_2, %c0_3] : memref<8x128xf32, #tpu.memory_space<vmem>>, vector<8x128xf32>
    %c0_4 = arith.constant 0 : index
    %c0_5 = arith.constant 0 : index
    %5 = vector.load %arg4[%c0_4, %c0_5] : memref<128x128xf32, #tpu.memory_space<vmem>>, vector<128x128xf32>
    %cst = arith.constant dense<0.000000e+00> : vector<8x128xf32>
    %6 = tpu.matmul %4, %5, %cst {dimension_numbers = #tpu.dot_dimension_numbers<[1], [1], [0], [0], [0, 0, 1, 0], [], []>} : vector<8x128xf32>, vector<128x128xf32>, vector<8x128xf32> -> vector<8x128xf32>
    %7 = arith.addf %3, %6 : vector<8x128xf32>
    %c0_6 = arith.constant 0 : index
    %c0_7 = arith.constant 0 : index
    %8 = vector.load %arg5[%c0_6, %c0_7] : memref<8x128xf32, #tpu.memory_space<vmem>>, vector<8x128xf32>
    tpu.vector_store %arg5[%c0_6, %c0_7], %7 {strides = array<i32>} : memref<8x128xf32, #tpu.memory_space<vmem>>, vector<8x128xf32>,
    %c0_i32_8 = arith.constant 0 : i32
    %9 = arith.cmpi eq, %arg2, %c0_i32_8 : i32
    %10 = arith.extui %9 : i1 to i32
    %c0_i32_9 = arith.constant 0 : i32
    %11 = arith.cmpi ne, %10, %c0_i32_9 : i32
    scf.if %11 {
      %c0_10 = arith.constant 0 : index
      %c0_11 = arith.constant 0 : index
      %12 = vector.load %arg5[%c0_10, %c0_11] : memref<8x128xf32, #tpu.memory_space<vmem>>, vector<8x128xf32>
      %cst_12 = arith.constant 0.000000e+00 : f32
      %13 = vector.broadcast %cst_12 : f32 to vector<8x128xf32>
      %14 = arith.maximumf %12, %13 : vector<8x128xf32>
      %c0_13 = arith.constant 0 : index
      %c0_14 = arith.constant 0 : index
      %15 = vector.load %arg5[%c0_13, %c0_14] : memref<8x128xf32, #tpu.memory_space<vmem>>, vector<8x128xf32>
      tpu.vector_store %arg5[%c0_13, %c0_14], %14 {strides = array<i32>} : memref<8x128xf32, #tpu.memory_space<vmem>>, vector<8x128xf32>,
    } else {
    }
    return
  }
  func.func @transform_0(%arg0: i32, %arg1: i32, %arg2: i32) -> (i32, i32) {
    %c0_i32 = arith.constant 0 : i32
    return %arg0, %arg2 : i32, i32
  }
  func.func @transform_1(%arg0: i32, %arg1: i32, %arg2: i32) -> (i32, i32) {
    %c0_i32 = arith.constant 0 : i32
    return %arg1, %arg2 : i32, i32
  }
  func.func @transform_2(%arg0: i32, %arg1: i32, %arg2: i32) -> (i32, i32) {
    %c0_i32 = arith.constant 0 : i32
    return %arg0, %arg1 : i32, i32
  }
}

</mosaic_0001>

<bundles_post_ra>
// kernel: tpu_custom_call.1
= control target key start
LH: loop header
LB: loop body
LE: loop exit
PB: predicated region body
PF: predicated region fallthrough
CT: control target
= control target key end

     0   :  { %7 = vsyncpa [#allocation3], 0  ;;  %s377_s0 = inlined_call_operand.hbm [shape: f32[8,128], index: 0, kind: input, shape index: {}]   ;;  %s378_s1 = inlined_call_operand.hbm [shape: f32[128,128], index: 1, kind: input, shape index: {}]   ;;  %s379_s2 = inlined_call_operand.hbm [shape: f32[8,128], index: 2, kind: output, shape index: {}]  }
   0x1   :  { %8 = vsyncpa [#allocation6], 0 }
   0x2   :  { %9 = vsyncpa [#allocation4], 0  ;;  %s311_s9 = smov [#allocation2]   ;;  %s312_s11 = smov [#allocation5]  }
   0x3   :  { %s16_s10 = sshll.u32 %s311_s9, 4  ;;  %s25_s12 = sshll.u32 %s312_s11, 4  ;;  %s17_s10 = int_to_ptr.vmem [resolvable:$true] %s16_s10  ;;  %s334_s12 = int_to_ptr.vmem [resolvable:$true] %s25_s12 }
   0x4   :  { %s239_s15 = scalar_lea.hbm %s377_s0, 128 }
   0x5   :  { %p240_p0 = scmp.ne.s32.totalorder %s377_s0, %s239_s15  ;;  %p243_p1 = scmp.lt.u32.totalorder %s239_s15, %s377_s0 }
   0x7   :  { %p245_p2 = pnand %p243_p1, %p240_p0 }
   0x9   :  { %248 = shalt.err (!%p245_p2)
}
   0xa   :  { %s249_s20 = scalar_lea.vmem %s17_s10, 128  ;;  %p254_p4 = scmp.lt.s32.totalorder %s17_s10, %s17_s10 }
   0xb   :  { %p250_p3 = scmp.ne.s32.totalorder %s17_s10, %s249_s20  ;;  %p255_p5 = scmp.lt.s32.totalorder %s249_s20, %s249_s20 }
   0xd   :  { %p256_p6 = por %p255_p5, %p254_p4 }
   0xf   :  { %p257_p7 = pnand %p256_p6, %p250_p3 }
  0x11   :  { %260 = shalt.err (!%p257_p7)
}
  0x12   :  { %19 = dma.hbm_to_vmem [thread:$0]  %s377_s0, 128, %s17_s10, [#allocation3]  }
  0x13   :  { %s261_s25 = scalar_lea.hbm %s378_s1, 2048 }
  0x14   :  { %p262_p8 = scmp.ne.s32.totalorder %s378_s1, %s261_s25  ;;  %p265_p9 = scmp.lt.u32.totalorder %s261_s25, %s378_s1 }
  0x16   :  { %p267_p10 = pnand %p265_p9, %p262_p8 }
  0x18   :  { %270 = shalt.err (!%p267_p10)
}
  0x19   :  { %s271_s30 = scalar_lea.vmem %s334_s12, 2048  ;;  %p276_p12 = scmp.lt.s32.totalorder %s334_s12, %s334_s12 }
  0x1a   :  { %p272_p11 = scmp.ne.s32.totalorder %s334_s12, %s271_s30  ;;  %p277_p13 = scmp.lt.s32.totalorder %s271_s30, %s271_s30 }
  0x1c   :  { %p278_p0 = por %p277_p13, %p276_p12 }
  0x1e   :  { %p279_p1 = pnand %p278_p0, %p272_p11 }
  0x20   :  { %282 = shalt.err (!%p279_p1)
}
  0x21   :  { %s313_s0 = smov 128   ;;  %s314_s3 = smov 8  }
  0x22   :  { %31 = dma.hbm_to_vmem [thread:$0]  %s378_s1, 2048, %s334_s12, [#allocation6], %s313_s0, %s313_s0, %s314_s3  }
  0x23   :  { %305 = dma.done.wait [#allocation3], 128  }
  0x24   :  { %306 = vsyncadd [#allocation3], 4294967168 }
  0x25   :  { %307 = dma.done.wait [#allocation6], 2048  }
  0x26   :  { %308 = vsyncadd [#allocation6], 4294965248  ;;  %v315_v0 = vmov 0.0|0.0   ;;  %vm316_vm0 = vmmov 0   ;;  %v317_v1 = vmov 0.0   ;;  %v45_v2 = vld [vmem:[#allocation5] sm:$0xff] }
  0x27   :  { %207 = vmatprep.subr.bf16.mxu0 %v315_v0  ;;  %204 = vmatprep.mubr.msk.f32.mxu0 %vm316_vm0, %v317_v1  ;;  %v46_v3 = vld [vmem:[#allocation5 + $0x8] sm:$0xff]  ;;  %v47_v5 = vld [vmem:[#allocation5 + $0x10] sm:$0xff]  ;;  %v48_v6 = vld [vmem:[#allocation5 + $0x18] sm:$0xff]  ;;  %s318_s1 = smov [#allocation7]  }
  0x28   :  { %v208_v4 = vpack.c.bf16 %v46_v3, %v45_v2  ;;  %v211_v7 = vpack.c.bf16 %v48_v6, %v47_v5  ;;  %v49_v8 = vld [vmem:[#allocation5 + $0x20] sm:$0xff]  ;;  %v50_v9 = vld [vmem:[#allocation5 + $0x28] sm:$0xff]  ;;  %v51_v11 = vld [vmem:[#allocation5 + $0x30] sm:$0xff]  ;;  %s145_s6 = sshll.u32 %s318_s1, 4  ;;  %s146_s6 = int_to_ptr.vmem [resolvable:$true] %s145_s6 }
  0x29   :  { %v214_v10 = vpack.c.bf16 %v50_v9, %v49_v8  ;;  %v52_v12 = vld [vmem:[#allocation5 + $0x38] sm:$0xff]  ;;  %v53_v14 = vld [vmem:[#allocation5 + $0x40] sm:$0xff]  ;;  %v54_v15 = vld [vmem:[#allocation5 + $0x48] sm:$0xff]  ;;  %s283_s7 = scalar_lea.vmem %s146_s6, 128  ;;  %p288_p3 = scmp.lt.s32.totalorder %s146_s6, %s146_s6 }
  0x2a   :  { %209 = vmatpush3.bf16.xpose.msra.mxu0 %v208_v4  ;;  %v217_v13 = vpack.c.bf16 %v52_v12, %v51_v11  ;;  %v220_v16 = vpack.c.bf16 %v54_v15, %v53_v14  ;;  %v55_v17 = vld [vmem:[#allocation5 + $0x50] sm:$0xff]  ;;  %v56_v18 = vld [vmem:[#allocation5 + $0x58] sm:$0xff]  ;;  %v57_v20 = vld [vmem:[#allocation5 + $0x60] sm:$0xff]  ;;  %p284_p2 = scmp.ne.s32.totalorder %s146_s6, %s283_s7  ;;  %p289_p4 = scmp.lt.s32.totalorder %s283_s7, %s283_s7 }
  0x2b   :  { %210 = vmatprep.subr.bf16.mxu0 %v315_v0  ;;  %v223_v19 = vpack.c.bf16 %v56_v18, %v55_v17  ;;  %v58_v21 = vld [vmem:[#allocation5 + $0x68] sm:$0xff]  ;;  %v59_v23 = vld [vmem:[#allocation5 + $0x70] sm:$0xff]  ;;  %v60_v24 = vld [vmem:[#allocation5 + $0x78] sm:$0xff] }
  0x2c   :  { %v226_v22 = vpack.c.bf16 %v58_v21, %v57_v20  ;;  %v229_v25 = vpack.c.bf16 %v60_v24, %v59_v23  ;;  %v44_v26 = vld [vmem:[#allocation2] sm:$0xff]  ;;  %p290_p5 = por %p289_p4, %p288_p3 }
  0x2e   :  { %p291_p6 = pnand %p290_p5, %p284_p2 }
  0x32   :  { %212 = vmatpush3.bf16.xpose.msra.mxu0 %v211_v7 }
  0x33   :  { %213 = vmatprep.subr.bf16.mxu0 %v315_v0 }
  0x3a   :  { %215 = vmatpush3.bf16.xpose.msra.mxu0 %v214_v10 }
  0x3b   :  { %216 = vmatprep.subr.bf16.mxu0 %v315_v0 }
  0x42   :  { %218 = vmatpush3.bf16.xpose.msra.mxu0 %v217_v13 }
  0x43   :  { %219 = vmatprep.subr.bf16.mxu0 %v315_v0 }
  0x4a   :  { %221 = vmatpush3.bf16.xpose.msra.mxu0 %v220_v16 }
  0x4b   :  { %222 = vmatprep.subr.bf16.mxu0 %v315_v0 }
  0x52   :  { %224 = vmatpush3.bf16.xpose.msra.mxu0 %v223_v19 }
  0x53   :  { %225 = vmatprep.subr.bf16.mxu0 %v315_v0 }
  0x5a   :  { %227 = vmatpush3.bf16.xpose.msra.mxu0 %v226_v22 }
  0x5b   :  { %228 = vmatprep.subr.bf16.mxu0 %v315_v0 }
  0x62   :  { %230 = vmatpush3.bf16.xpose.msra.mxu0 %v229_v25 }
  0x69   :  { %205 = vmatmul.mubr.f32.vlgmr.msra.gmra.mrb[0].mxu0 %v44_v26 }
 0x13c   :  { %v127_v27 = vpop.f32.mrb[0].mxu0 }
 0x13d   :  { %v206_v28 = vpop.f32.mrb[1].mxu0  ;;  %v137_v29 = vmax.f32 %v127_v27, 0.0 }
 0x13f   :  { %138 = vst [vmem:[#allocation7] sm:$0xff] %v137_v29 }
 0x140   :  { %294 = shalt.err (!%p291_p6)
}
 0x141   :  { %s295_s10 = scalar_lea.hbm %s379_s2, 128 }
 0x142   :  { %p296_p7 = scmp.ne.s32.totalorder %s379_s2, %s295_s10  ;;  %p299_p8 = scmp.lt.u32.totalorder %s295_s10, %s379_s2 }
 0x144   :  { %p301_p9 = pnand %p299_p8, %p296_p7 }
 0x146   :  { %304 = shalt.err (!%p301_p9)
}
 0x147   :  { %148 = dma.vmem_to_hbm [thread:$0]  %s146_s6, 128, %s379_s2, [#allocation4]  }
 0x148   :  { %309 = dma.done.wait [#allocation4], 128  }
 0x149   :  { %310 = vsyncadd [#allocation4], 4294967168 }
 0x14a   :  { %152 = vsyncpa [#allocation3], 1 }
 0x14b   :  { %153 = vsyncpa [#allocation6], 1 }
 0x14c   :  { %154 = vsyncpa [#allocation4], 1 }

</bundles_post_ra>
